<compile_context>
chip_gen: v7x
topology: tpu7x:2x2x1
jax: 0.10.0
libtpu: 0.0.40
codegen_flags: <defaults>
</compile_context>

<pallas_src>
import functools

import jax
import jax.numpy as jnp
from jax.experimental import pallas as pl
from jax.experimental.pallas import tpu as pltpu

_LANES = 1024        # lane-dense last dim (multiple of 128)
_TILE_R_MAX = 512    # rows per tile -> 2 MiB/buffer in f32


def _quant_act_kernel(x_ref, o_ref, *, q):
    """Elementwise: clamp to [0,1], then k-bit uniform quantization."""
    x = jnp.clip(x_ref[...], 0.0, 1.0)
    # round-half-to-even (matches torch.round); true division to match ref.
    o_ref[...] = jnp.round(x * q) / q


def quantization_activation(x: jnp.ndarray, a_bits: int) -> jnp.ndarray:
    """Forward pass of QuantizationActivation(a_bits). x: any-shape float array."""
    if a_bits == 32:
        return x  # identity, no quantization

    q = float(2 ** a_bits - 1)
    orig_shape = x.shape
    total = x.size
    itemsize = jnp.dtype(x.dtype).itemsize
    # sublane alignment: 8 rows of 32-bit; packed dtypes need more rows
    sublane = max(8, 32 // itemsize)

    lanes = _LANES
    rows = -(-total // lanes)                       # ceil
    rows_aligned = -(-rows // sublane) * sublane    # multiple of sublane
    tile_r = min(_TILE_R_MAX, rows_aligned)
    rows_padded = -(-rows_aligned // tile_r) * tile_r
    pad = rows_padded * lanes - total

    x_flat = x.reshape(-1)
    if pad:
        x_flat = jnp.pad(x_flat, (0, pad))
    x2d = x_flat.reshape(rows_padded, lanes)

    grid = (rows_padded // tile_r,)

    out2d = pl.pallas_call(
        functools.partial(_quant_act_kernel, q=q),
        out_shape=jax.ShapeDtypeStruct((rows_padded, lanes), x2d.dtype),
        grid=grid,
        in_specs=[pl.BlockSpec((tile_r, lanes), lambda i: (i, 0))],
        out_specs=pl.BlockSpec((tile_r, lanes), lambda i: (i, 0)),
        input_output_aliases={0: 0},
        cost_estimate=pl.CostEstimate(
            flops=5 * rows_padded * lanes,          # 2 clamp + mul + round + div
            transcendentals=0,
            bytes_accessed=2 * rows_padded * lanes * itemsize,
        ),
        compiler_params=pltpu.CompilerParams(
            dimension_semantics=("parallel",),
        ),
    )(x2d)

    out_flat = out2d.reshape(-1)
    if pad:
        out_flat = out_flat[:total]
    return out_flat.reshape(orig_shape)


def _reference(x: jnp.ndarray, a_bits: int) -> jnp.ndarray:
    if a_bits == 32:
        return x
    q = 2 ** a_bits - 1
    return jnp.round(jnp.clip(x, 0.0, 1.0) * q) / q


if __name__ == "__main__":
    key = jax.random.PRNGKey(0)
    k1, k2 = jax.random.split(key)

    # Case 1: small NCHW activation, values spread around [-1, 2] to exercise clamp.
    x1 = jax.random.uniform(k1, (2, 4, 16, 16), dtype=jnp.float32,
                            minval=-1.0, maxval=2.0)
    out1 = jax.block_until_ready(quantization_activation(x1, 2))
    ref1 = _reference(x1, 2)
    assert out1.shape == x1.shape and out1.dtype == x1.dtype
    assert jnp.allclose(out1, ref1, atol=1e-6), "mismatch vs reference (case 1)"

    # Case 2: non-(8,128)-friendly spatial dims (7x7) to exercise pad/flatten path.
    x2 = jax.random.uniform(k2, (2, 3, 7, 7), dtype=jnp.float32,
                            minval=-1.0, maxval=2.0)
    out2 = jax.block_until_ready(quantization_activation(x2, 4))
    ref2 = _reference(x2, 4)
    assert out2.shape == x2.shape and out2.dtype == x2.dtype
    assert jnp.allclose(out2, ref2, atol=1e-6), "mismatch vs reference (case 2)"

    # Case 3: a_bits == 32 identity path.
    out3 = jax.block_until_ready(quantization_activation(x1, 32))
    assert jnp.array_equal(out3, x1)

    print("KERNEL_OK")
</pallas_src>

<mosaic_0001>
module attributes {stable_mosaic.version = 11 : i64} {
  func.func @_quant_act_kernel(%arg0: i32, %arg1: memref<8x1024xf32, #tpu.memory_space<vmem>>, %arg2: memref<8x1024xf32, #tpu.memory_space<vmem>>) attributes {dimension_semantics = [#tpu.dimension_semantics<parallel>], iteration_bounds = array<i64: 1>, scalar_prefetch = 0 : i64, scratch_operands = 0 : i64, tpu.core_type = #tpu.core_type<tc>, window_params = [{transform_indices = @transform_0, window_bounds = array<i64: 8, 1024>}, {transform_indices = @transform_1, window_bounds = array<i64: 8, 1024>}]} {
    %c0 = arith.constant 0 : index
    %c0_0 = arith.constant 0 : index
    %0 = vector.load %arg1[%c0, %c0_0] : memref<8x1024xf32, #tpu.memory_space<vmem>>, vector<8x1024xf32>
    %cst = arith.constant 0.000000e+00 : f32
    %cst_1 = arith.constant 1.000000e+00 : f32
    %1 = vector.broadcast %cst : f32 to vector<8x1024xf32>
    %2 = arith.maximumf %1, %0 : vector<8x1024xf32>
    %3 = vector.broadcast %cst_1 : f32 to vector<8x1024xf32>
    %4 = arith.minimumf %3, %2 : vector<8x1024xf32>
    %cst_2 = arith.constant 3.000000e+00 : f32
    %5 = vector.broadcast %cst_2 : f32 to vector<8x1024xf32>
    %6 = arith.mulf %4, %5 : vector<8x1024xf32>
    %7 = math.roundeven %6 : vector<8x1024xf32>
    %cst_3 = arith.constant 3.000000e+00 : f32
    %8 = vector.broadcast %cst_3 : f32 to vector<8x1024xf32>
    %9 = arith.divf %7, %8 : vector<8x1024xf32>
    %c0_4 = arith.constant 0 : index
    %c0_5 = arith.constant 0 : index
    %10 = vector.load %arg2[%c0_4, %c0_5] : memref<8x1024xf32, #tpu.memory_space<vmem>>, vector<8x1024xf32>
    tpu.vector_store %arg2[%c0_4, %c0_5], %9 {strides = array<i32>} : memref<8x1024xf32, #tpu.memory_space<vmem>>, vector<8x1024xf32>,
    return
  }
  func.func @transform_0(%arg0: i32) -> (i32, i32) {
    %c0_i32 = arith.constant 0 : i32
    %c0_i32_0 = arith.constant 0 : i32
    return %arg0, %c0_i32 : i32, i32
  }
  func.func @transform_1(%arg0: i32) -> (i32, i32) {
    %c0_i32 = arith.constant 0 : i32
    %c0_i32_0 = arith.constant 0 : i32
    return %arg0, %c0_i32 : i32, i32
  }
}

</mosaic_0001>

<bundles_post_ra>
// kernel: tpu_custom_call.1
= control target key start
LH: loop header
LB: loop body
LE: loop exit
PB: predicated region body
PF: predicated region fallthrough
CT: control target
= control target key end

     0   :  { %6 = vsyncpa [#allocation3], 0  ;;  %s187_s0 = inlined_call_operand.hbm [shape: f32[8,1024], index: 0, kind: input, shape index: {}, may-alias: {0,1}]   ;;  %s188_s1 = inlined_call_operand.hbm [shape: f32[8,1024], index: 1, kind: output, shape index: {}, may-alias: {0,1}]  }
   0x1   :  { %7 = vsyncpa [#allocation4], 0  ;;  %s151_s6 = smov [#allocation2]   ;;  %s103_s10 = scalar_lea.hbm %s187_s0, 1024 }
   0x2   :  { %s14_s7 = sshll.u32 %s151_s6, 4  ;;  %p104_p0 = scmp.ne.s32.totalorder %s187_s0, %s103_s10  ;;  %s15_s7 = int_to_ptr.vmem [resolvable:$true] %s14_s7 }
   0x3   :  { %p107_p1 = scmp.lt.u32.totalorder %s103_s10, %s187_s0 }
   0x5   :  { %p109_p2 = pnand %p107_p1, %p104_p0 }
   0x7   :  { %112 = shalt.err (!%p109_p2)
}
   0x8   :  { %s113_s15 = scalar_lea.vmem %s15_s7, 1024  ;;  %p118_p4 = scmp.lt.s32.totalorder %s15_s7, %s15_s7 }
   0x9   :  { %p114_p3 = scmp.ne.s32.totalorder %s15_s7, %s113_s15  ;;  %p119_p5 = scmp.lt.s32.totalorder %s113_s15, %s113_s15 }
   0xb   :  { %p120_p6 = por %p119_p5, %p118_p4 }
   0xd   :  { %p121_p7 = pnand %p120_p6, %p114_p3 }
   0xf   :  { %124 = shalt.err (!%p121_p7)
}
  0x10   :  { %17 = dma.hbm_to_vmem [thread:$0]  %s187_s0, 1024, %s15_s7, [#allocation3]  }
  0x11   :  { %147 = dma.done.wait [#allocation3], 1024  }
  0x12   :  { %148 = vsyncadd [#allocation3], 4294966272  ;;  %v21_v0 = vld [vmem:[#allocation2] sm:$0xff]  ;;  %v22_v1 = vld [vmem:[#allocation2 + $0x8] sm:$0xff]  ;;  %s152_s0 = smov [#allocation5]  }
  0x13   :  { %v23_v2 = vld [vmem:[#allocation2 + $0x10] sm:$0xff]  ;;  %v29_v3 = vmax.f32 %v21_v0, 0.0  ;;  %v30_v4 = vmax.f32 %v22_v1, 0.0  ;;  %v24_v6 = vld [vmem:[#allocation2 + $0x18] sm:$0xff]  ;;  %v25_v7 = vld [vmem:[#allocation2 + $0x20] sm:$0xff]  ;;  %s84_s18 = sshll.u32 %s152_s0, 4  ;;  %s85_s18 = int_to_ptr.vmem [resolvable:$true] %s84_s18 }
  0x14   :  { %v31_v5 = vmax.f32 %v23_v2, 0.0  ;;  %v26_v8 = vld [vmem:[#allocation2 + $0x28] sm:$0xff]  ;;  %v32_v9 = vmax.f32 %v24_v6, 0.0  ;;  %v33_v10 = vmax.f32 %v25_v7, 0.0  ;;  %v27_v12 = vld [vmem:[#allocation2 + $0x30] sm:$0xff]  ;;  %v28_v13 = vld [vmem:[#allocation2 + $0x38] sm:$0xff]  ;;  %p130_p9 = scmp.lt.s32.totalorder %s85_s18, %s85_s18 }
  0x15   :  { %v34_v11 = vmax.f32 %v26_v8, 0.0  ;;  %v37_v14 = vmin.f32 %v29_v3, 1.0  ;;  %v38_v15 = vmin.f32 %v30_v4, 1.0  ;;  %v35_v17 = vmax.f32 %v27_v12, 0.0  ;;  %s125_s19 = scalar_lea.vmem %s85_s18, 1024 }
  0x16   :  { %v39_v16 = vmin.f32 %v31_v5, 1.0  ;;  %v40_v18 = vmin.f32 %v32_v9, 1.0  ;;  %v41_v19 = vmin.f32 %v33_v10, 1.0  ;;  %v36_v21 = vmax.f32 %v28_v13, 0.0  ;;  %p126_p8 = scmp.ne.s32.totalorder %s85_s18, %s125_s19  ;;  %p131_p10 = scmp.lt.s32.totalorder %s125_s19, %s125_s19 }
  0x17   :  { %v42_v20 = vmin.f32 %v34_v11, 1.0  ;;  %v45_v22 = vmul.f32 3.0, %v37_v14  ;;  %v46_v23 = vmul.f32 3.0, %v38_v15  ;;  %v43_v25 = vmin.f32 %v35_v17, 1.0 }
  0x18   :  { %v47_v24 = vmul.f32 3.0, %v39_v16  ;;  %v48_v26 = vmul.f32 3.0, %v40_v18  ;;  %v49_v27 = vmul.f32 3.0, %v41_v19  ;;  %v44_v29 = vmin.f32 %v36_v21, 1.0  ;;  %p132_p11 = por %p131_p10, %p130_p9 }
  0x19   :  { %v50_v28 = vmul.f32 3.0, %v42_v20  ;;  %v93_v30 = vround.rtne.f32 %v45_v22  ;;  %v94_v31 = vround.rtne.f32 %v46_v23  ;;  %v51_v33 = vmul.f32 3.0, %v43_v25 }
  0x1a   :  { %v95_v32 = vround.rtne.f32 %v47_v24  ;;  %v96_v34 = vround.rtne.f32 %v48_v26  ;;  %v97_v35 = vround.rtne.f32 %v49_v27  ;;  %v52_v37 = vmul.f32 3.0, %v44_v29  ;;  %p133_p12 = pnand %p132_p11, %p126_p8 }
  0x1b   :  { %v98_v36 = vround.rtne.f32 %v50_v28  ;;  %v62_v38 = vmul.f32 0.33333334, %v93_v30  ;;  %v63_v39 = vmul.f32 0.33333334, %v94_v31  ;;  %v99_v41 = vround.rtne.f32 %v51_v33 }
  0x1c   :  { %v64_v40 = vmul.f32 0.33333334, %v95_v32  ;;  %v65_v42 = vmul.f32 0.33333334, %v96_v34  ;;  %v66_v43 = vmul.f32 0.33333334, %v97_v35  ;;  %v100_v45 = vround.rtne.f32 %v52_v37 }
  0x1d   :  { %v67_v44 = vmul.f32 0.33333334, %v98_v36  ;;  %70 = vst [vmem:[#allocation5] sm:$0xff] %v62_v38  ;;  %71 = vst [vmem:[#allocation5 + $0x8] sm:$0xff] %v63_v39  ;;  %v68_v46 = vmul.f32 0.33333334, %v99_v41 }
  0x1e   :  { %72 = vst [vmem:[#allocation5 + $0x10] sm:$0xff] %v64_v40  ;;  %73 = vst [vmem:[#allocation5 + $0x18] sm:$0xff] %v65_v42  ;;  %v69_v47 = vmul.f32 0.33333334, %v100_v45 }
  0x1f   :  { %74 = vst [vmem:[#allocation5 + $0x20] sm:$0xff] %v66_v43  ;;  %75 = vst [vmem:[#allocation5 + $0x28] sm:$0xff] %v67_v44 }
  0x20   :  { %76 = vst [vmem:[#allocation5 + $0x30] sm:$0xff] %v68_v46  ;;  %77 = vst [vmem:[#allocation5 + $0x38] sm:$0xff] %v69_v47 }
  0x21   :  { %136 = shalt.err (!%p133_p12)
}
  0x22   :  { %s137_s22 = scalar_lea.hbm %s188_s1, 1024 }
  0x23   :  { %p138_p13 = scmp.ne.s32.totalorder %s188_s1, %s137_s22  ;;  %p141_p0 = scmp.lt.u32.totalorder %s137_s22, %s188_s1 }
  0x25   :  { %p143_p1 = pnand %p141_p0, %p138_p13 }
  0x27   :  { %146 = shalt.err (!%p143_p1)
}
  0x28   :  { %87 = dma.vmem_to_hbm [thread:$0]  %s85_s18, 1024, %s188_s1, [#allocation4]  }
  0x29   :  { %149 = dma.done.wait [#allocation4], 1024  }
  0x2a   :  { %150 = vsyncadd [#allocation4], 4294966272 }
  0x2b   :  { %91 = vsyncpa [#allocation3], 1 }
  0x2c   :  { %92 = vsyncpa [#allocation4], 1 }

</bundles_post_ra>
